<compile_context>
chip_gen: v7x
topology: tpu7x:2x2x1
jax: 0.10.0
libtpu: 0.0.40
codegen_flags: <defaults>
</compile_context>

<pallas_src>
import jax
import jax.numpy as jnp
from jax import lax
from jax.experimental import pallas as pl
from jax.experimental.pallas import tpu as pltpu


def _patch_embed_kernel(x_ref, w_ref, b_ref, o_ref):
    # In-kernel f32 -> bf16 cast of the streamed X tile (VPU, hidden under DMA),
    # then a plain (tm, D) @ (D, E) MXU matmul with f32 accumulation and a
    # fused bias add.
    xb = x_ref[...].astype(w_ref.dtype)
    acc = lax.dot_general(
        xb,
        w_ref[...],
        dimension_numbers=(((1,), (0,)), ((), ())),
        preferred_element_type=jnp.float32,
    )
    o_ref[...] = (acc + b_ref[...]).astype(o_ref.dtype)


def _round_up(a, m):
    return ((a + m - 1) // m) * m


def patch_embed_forward(
    x,
    weight,
    bias,
    *,
    num_views,
    num_det,
    compute_dtype=jnp.bfloat16,
    out_dtype=jnp.float32,
    block_m=2048,
):
    """Pallas implementation of PatchEmbed.forward.

    Args:
      x:      (B, C, V, D) float32, NCHW (PyTorch convention).
      weight: (E, 1, 1, D) float32, Conv2d weight.
      bias:   (E,) float32, Conv2d bias.
    Returns:
      (B, V, E) in `out_dtype` (float32 by default, matching the module).
    """
    B, C, V, D = x.shape
    if C == 3:
        # TODO(synk): the PyTorch reference's C==3 branch drops the channel dim
        # (torch.mean(dim=1)) which only type-checks when num_views == 1; we keep
        # the channel dim so the 1xD conv stays well-defined.  The mean is done
        # here in the wrapper; fusing it into the kernel (averaging three
        # (tm, D) slabs on the VPU) would save one extra HBM pass for 3-channel
        # inputs.
        x = jnp.mean(x, axis=1, keepdims=True)
    assert x.shape[1] == 1, f"Input image channel is wrong ({C}), please check it"
    assert D == num_det, f"Input image height ({D}) doesn't match model ({num_det})."
    assert V == num_views, f"Input image width ({V}) doesn't match model ({num_views})."

    E = weight.shape[0]
    M = B * V

    # Glue. x reshape is a free view (C axis is size-1); the weight transpose is
    # a one-time 64 KiB op, avoiding any per-grid-step rhs transpose in-kernel.
    x2d = x.reshape(M, D)                                               # (M, D) f32, cast in-kernel
    w2d = jnp.transpose(weight.reshape(E, D)).astype(compute_dtype)     # (D, E) bf16, VMEM-resident
    b2d = bias.reshape(1, E).astype(jnp.float32)                        # (1, E), VMEM-resident

    # Tile the M axis.  Large tiles amortize the ~0.35 us per-grid-step pipeline
    # overhead, but clamp so grid_m >= 2 when possible: with
    # dimension_semantics=("parallel",) v7x's megacore shards the steps across
    # both TensorCores.  Block first dim must be a multiple of 8 (f32 sublane);
    # a ragged last tile is fine (OOB reads padded, OOB writes discarded, and
    # the matmul is row-independent).
    tm = max(8, min(block_m, _round_up(pl.cdiv(M, 2), 8)))
    grid_m = pl.cdiv(M, tm)

    out_itemsize = jnp.dtype(out_dtype).itemsize
    x_bytes = M * D * x2d.dtype.itemsize
    w_bytes = E * D * jnp.dtype(compute_dtype).itemsize
    o_bytes = M * E * out_itemsize
    cost = pl.CostEstimate(
        flops=2 * M * D * E,
        transcendentals=0,
        bytes_accessed=x_bytes + w_bytes + o_bytes,
    )

    # VMEM working set: double-buffered X and O tiles + resident W/bias.  Only
    # raise the scoped limit when the tile choice actually needs it (keeps a
    # v6e-tuned block_m from silently overshooting v7x's 64 MiB physical VMEM).
    vmem_needed = 2 * tm * D * 4 + 2 * tm * E * out_itemsize + w_bytes + E * 4
    compiler_kwargs = dict(dimension_semantics=("parallel",))
    if vmem_needed > 32 * 1024 * 1024:
        compiler_kwargs["vmem_limit_bytes"] = min(
            int(vmem_needed * 1.25), 60 * 1024 * 1024
        )

    out2d = pl.pallas_call(
        _patch_embed_kernel,
        out_shape=jax.ShapeDtypeStruct((M, E), out_dtype),
        grid_spec=pltpu.PrefetchScalarGridSpec(
            num_scalar_prefetch=0,
            grid=(grid_m,),
            in_specs=[
                pl.BlockSpec((tm, D), lambda i: (i, 0)),   # X: streamed f32 tile
                pl.BlockSpec((D, E), lambda i: (0, 0)),    # W: resident bf16
                pl.BlockSpec((1, E), lambda i: (0, 0)),    # bias: resident
            ],
            out_specs=pl.BlockSpec((tm, E), lambda i: (i, 0)),
        ),
        compiler_params=pltpu.CompilerParams(**compiler_kwargs),
        cost_estimate=cost,
    )(x2d, w2d, b2d)

    # norm_layer=None -> Identity, nothing to do.
    return out2d.reshape(B, V, E)


def _reference(x, weight, bias, compute_dtype=jnp.bfloat16):
    """Plain-JAX reference with matching bf16-input / f32-accumulate numerics."""
    E = weight.shape[0]
    D = weight.shape[-1]
    xb = x[:, 0].astype(compute_dtype).astype(jnp.float32)
    wb = weight.reshape(E, D).astype(compute_dtype).astype(jnp.float32)
    return jnp.einsum("bvd,ed->bve", xb, wb) + bias[None, None, :]


if __name__ == "__main__":
    # Small, TPU-friendly shapes consistent with the module's forward.
    B = 2
    C = 1
    NUM_VIEWS = 8     # V
    NUM_DET = 128     # D (conv kernel spans the full detector axis)
    EMBED_DIM = 128   # E

    key = jax.random.PRNGKey(0)
    kx, kw, kb = jax.random.split(key, 3)

    x = jax.random.normal(kx, (B, C, NUM_VIEWS, NUM_DET), dtype=jnp.float32)
    # Deterministic parameter init (synthetic, not a checkpoint load).
    weight = jax.random.normal(kw, (EMBED_DIM, 1, 1, NUM_DET), dtype=jnp.float32) * 0.02
    bias = jax.random.normal(kb, (EMBED_DIM,), dtype=jnp.float32) * 0.02

    # 1) Tiny shape (grid of 2 small tiles).
    out = patch_embed_forward(x, weight, bias, num_views=NUM_VIEWS, num_det=NUM_DET)
    jax.block_until_ready(out)
    ref = _reference(x, weight, bias)
    assert out.shape == (B, NUM_VIEWS, EMBED_DIM), out.shape
    assert jnp.allclose(out, ref, atol=2e-3, rtol=2e-3), float(
        jnp.max(jnp.abs(out - ref))
    )

    # 2) Larger M = B*V exercising the tiled pipeline with a ragged last block
    #    (M = 3 * 700 = 2100 -> tm = 1056, grid of 2 steps, partial tail).
    B2, V2 = 3, 700
    x2 = jax.random.normal(
        jax.random.PRNGKey(1), (B2, 1, V2, NUM_DET), dtype=jnp.float32
    )
    out2 = patch_embed_forward(x2, weight, bias, num_views=V2, num_det=NUM_DET)
    jax.block_until_ready(out2)
    ref2 = _reference(x2, weight, bias)
    assert out2.shape == (B2, V2, EMBED_DIM), out2.shape
    assert jnp.allclose(out2, ref2, atol=2e-3, rtol=2e-3), float(
        jnp.max(jnp.abs(out2 - ref2))
    )

    print("KERNEL_OK")
</pallas_src>

<mosaic_0001>
module attributes {stable_mosaic.version = 11 : i64} {
  func.func @_patch_embed_kernel(%arg0: i32, %arg1: memref<8x128xf32, #tpu.memory_space<vmem>>, %arg2: memref<128x128xbf16, #tpu.memory_space<vmem>>, %arg3: memref<1x128xf32, #tpu.memory_space<vmem>>, %arg4: memref<8x128xf32, #tpu.memory_space<vmem>>) attributes {dimension_semantics = [#tpu.dimension_semantics<parallel>], iteration_bounds = array<i64: 2>, scalar_prefetch = 0 : i64, scratch_operands = 0 : i64, tpu.core_type = #tpu.core_type<tc>, window_params = [{transform_indices = @transform_0, window_bounds = array<i64: 8, 128>}, {pipeline_mode = #tpu.pipeline_mode<synchronous>, transform_indices = @transform_1, window_bounds = array<i64: 128, 128>}, {pipeline_mode = #tpu.pipeline_mode<synchronous>, transform_indices = @transform_2, window_bounds = array<i64: 1, 128>}, {transform_indices = @transform_3, window_bounds = array<i64: 8, 128>}]} {
    %c0 = arith.constant 0 : index
    %c0_0 = arith.constant 0 : index
    %0 = vector.load %arg1[%c0, %c0_0] : memref<8x128xf32, #tpu.memory_space<vmem>>, vector<8x128xf32>
    %1 = arith.truncf %0 : vector<8x128xf32> to vector<8x128xbf16>
    %c0_1 = arith.constant 0 : index
    %c0_2 = arith.constant 0 : index
    %2 = vector.load %arg2[%c0_1, %c0_2] : memref<128x128xbf16, #tpu.memory_space<vmem>>, vector<128x128xbf16>
    %cst = arith.constant dense<0.000000e+00> : vector<8x128xf32>
    %3 = tpu.matmul %1, %2, %cst {dimension_numbers = #tpu.dot_dimension_numbers<[1], [0], [0], [1], [0, 0, 1, 1], [], []>} : vector<8x128xbf16>, vector<128x128xbf16>, vector<8x128xf32> -> vector<8x128xf32>
    %c0_3 = arith.constant 0 : index
    %c0_4 = arith.constant 0 : index
    %4 = vector.load %arg3[%c0_3, %c0_4] : memref<1x128xf32, #tpu.memory_space<vmem>>, vector<1x128xf32>
    %5 = vector.broadcast %4 : vector<1x128xf32> to vector<8x128xf32>
    %6 = arith.addf %3, %5 : vector<8x128xf32>
    %c0_5 = arith.constant 0 : index
    %c0_6 = arith.constant 0 : index
    %7 = vector.load %arg4[%c0_5, %c0_6] : memref<8x128xf32, #tpu.memory_space<vmem>>, vector<8x128xf32>
    tpu.vector_store %arg4[%c0_5, %c0_6], %6 {strides = array<i32>} : memref<8x128xf32, #tpu.memory_space<vmem>>, vector<8x128xf32>,
    return
  }
  func.func @transform_0(%arg0: i32) -> (i32, i32) {
    %c0_i32 = arith.constant 0 : i32
    %c0_i32_0 = arith.constant 0 : i32
    return %arg0, %c0_i32 : i32, i32
  }
  func.func @transform_1(%arg0: i32) -> (i32, i32) {
    %c0_i32 = arith.constant 0 : i32
    %c0_i32_0 = arith.constant 0 : i32
    %c0_i32_1 = arith.constant 0 : i32
    return %c0_i32, %c0_i32_0 : i32, i32
  }
  func.func @transform_2(%arg0: i32) -> (i32, i32) {
    %c0_i32 = arith.constant 0 : i32
    %c0_i32_0 = arith.constant 0 : i32
    %c0_i32_1 = arith.constant 0 : i32
    return %c0_i32, %c0_i32_0 : i32, i32
  }
  func.func @transform_3(%arg0: i32) -> (i32, i32) {
    %c0_i32 = arith.constant 0 : i32
    %c0_i32_0 = arith.constant 0 : i32
    return %arg0, %c0_i32 : i32, i32
  }
}

</mosaic_0001>

<bundles_post_ra>
// kernel: tpu_custom_call.1
= control target key start
LH: loop header
LB: loop body
LE: loop exit
PB: predicated region body
PF: predicated region fallthrough
CT: control target
= control target key end

     0   :  { %8 = vsyncpa [#allocation3], 0  ;;  %s891_s0 = inlined_call_operand.hbm [shape: f32[16,128], index: 0, kind: input, shape index: {}]   ;;  %s892_s1 = inlined_call_operand.hbm [shape: bf16[128,128], index: 1, kind: input, shape index: {}]   ;;  %s893_s2 = inlined_call_operand.vmem [shape: f32[1,128], index: 2, kind: input, shape index: {}]   ;;  %s894_s3 = inlined_call_operand.hbm [shape: f32[16,128], index: 3, kind: output, shape index: {}]  }
   0x1   :  { %10 = vsyncpa [#allocation3 + $0x1], 0 }
   0x2   :  { %11 = vsyncpa [#allocation6], 0 }
   0x3   :  { %12 = vsyncpa [#allocation4], 0 }
   0x4   :  { %14 = vsyncpa [#allocation4 + $0x1], 0  ;;  %s688_s12 = smov 0   ;;  %s690_s13 = smov 0  }
   0x5   :  { %s692_s14 = smov 0   ;;  %s694_s15 = smov 0  }
   0x6 LB: > { %s709_s16 = sadd.s32 4294967295, %s659_s15   ;;  %s410_s17 = sadd.s32 4294967294, %s659_s15   ;;  %s659_s15 = sphi %s694_s15, %s914_s15   ;;  %s655_s14 = sphi %s692_s14, %s913_s14   ;;  %s651_s13 = sphi %s690_s13, %s912_s13   ;;  %s647_s12 = sphi %s688_s12, %s911_s12  }
   0x7   : > { %p40_p0 = scmp.ne.s32.totalorder %s651_s13, %s647_s12  ;;  %p895_p1 = scmp.eq.s32.totalorder %s709_s16, 0 }
   0x8   : > { %p112_p3 = scmp.eq.s32.totalorder %s410_s17, 1  ;;  %p411_p5 = scmp.ge.s32.totalorder %s659_s15, 1 }
   0x9   : > { %p718_p4 = por %p895_p1, %p40_p0  ;;  %p119_p7 = scmp.lt.s32.totalorder %s659_s15, 3 }
   0xa   : > { %p723_p6 = por %p112_p3, %p40_p0  ;;  %s661_s21 = smov [#allocation5]  }
   0xb   : > { %s898_s18 = scalar_select %p718_p4, 1, 0 }
   0xc   : > { %s899_s19 = scalar_select %p723_p6, 1, 0 }
   0xd   : > { %p728_p8 = pnand %p411_p5, %p119_p7  ;;  %s131_s22 = sshll.u32 %s661_s21, 4  ;;  %s732_s22 = int_to_ptr.vmem [resolvable:$true] %s131_s22 }
   0xe   : > { %s744_s24 = sadd.s32 1, %s659_s15   ;;  %s27_s25 = sadd.s32 1, %s655_s14 }
   0xf   : > { %s900_s20 = scalar_select %p728_p8, 1, 0 }
  0x10   : > { %p470_p9 = pneg %p728_p8  ;;  %s24_s26 = ssub.s32 %s659_s15, %s744_s24 }
  0x11   : > { %s531_s29 = scalar_lea.hbm %s892_s1, 1024 }
  0x12   : > { %p739_p11 = pnand %p470_p9, %p895_p1  ;;  %p532_p12 = scmp.ne.s32.totalorder %s892_s1, %s531_s29 }
  0x13   : > { %p538_p5 = scmp.lt.u32.totalorder %s531_s29, %s892_s1 }
  0x14   : > { %p533_p13 = pneg %p739_p11 }
  0x16   : > { %p534_p0 = pnand %p533_p13, %p532_p12 }
  0x18   : > { %p535_p3 = pneg %p534_p0 }
  0x1a   : > { %p540_p7 = pnand %p538_p5, %p535_p3 }
  0x1c   : > { %543 = shalt.err (!%p540_p7)
}
  0x1d   : > { %s544_s7 = scalar_lea.vmem %s732_s22, 1024  ;;  %p552_p2 = scmp.lt.s32.totalorder %s732_s22, %s732_s22 }
  0x1e   : > { %p545_p9 = scmp.ne.s32.totalorder %s732_s22, %s544_s7  ;;  %p553_p6 = scmp.lt.s32.totalorder %s544_s7, %s544_s7 }
  0x20   : > { %p547_p10 = pnand %p545_p9, %p533_p13  ;;  %p554_p4 = por %p553_p6, %p552_p2 }
  0x22   : > { %p548_p1 = pneg %p547_p10 }
  0x24   : > { %p555_p8 = pnand %p554_p4, %p548_p1 }
  0x26   : > { %558 = shalt.err (!%p555_p8)
}
  0x27   : > { %s662_s8 = smov 64   ;;  %s663_s9 = smov 4  }
  0x28   : > { %473 = dma.hbm_to_vmem [thread:$0]  (!%p739_p11), %s892_s1, 1024, %s732_s22, [#allocation6], %s662_s8, %s662_s8, %s663_s9  }
  0x29   : > { %p25_p2 = scmp.eq.s32.totalorder %s24_s26, 0  ;;  %p34_p1 = scmp.ne.s32.totalorder %s655_s14, %s651_s13 }
  0x2a   : > { %p35_p4 = scmp.eq.s32.totalorder %s659_s15, 0  ;;  %p483_p6 = scmp.lt.s32.totalorder %s659_s15, 2 }
  0x2b   : > { %s775_s17 = scalar_select %p25_p2, %s655_s14, %s27_s25  }
  0x2c   : > { %p36_p8 = por %p35_p4, %p34_p1  ;;  %p902_p10 = scmp.eq.s32.totalorder %s709_s16, 1 }
  0x2d   : > { %s148_s27 = sand.u32 1, %s655_s14   ;;  %s415_s28 = sshll.u32 %s659_s15, 7 }
  0x2e   : > { %p779_p12 = por %p902_p10, %p34_p1  ;;  %s414_s29 = sshll.u32 %s148_s27, 3 }
  0x2f   : > { %s788_s4 = scalar_lea.hbm %s891_s0, %s415_s28  ;;  %s152_s22 = scalar_lea.vmem [#allocation2], %s414_s29 }
  0x30   : > { %s159_s25 = sshll.u32 %s152_s22, 4  ;;  %p790_p11 = pnand %p483_p6, %p36_p8  ;;  %s794_s25 = int_to_ptr.vmem [resolvable:$true] %s159_s25 }
  0x31   : > { %s149_s5 = scalar_lea.sflag [#allocation3], %s148_s27  ;;  %s559_s6 = scalar_lea.hbm %s788_s4, 128 }
  0x32   : > { %p560_p13 = scmp.ne.s32.totalorder %s788_s4, %s559_s6  ;;  %p561_p0 = pneg %p790_p11 }
  0x33   : > { %s564_s9 = scalar_lea.hbm %s891_s0, 256  ;;  %p565_p7 = scmp.lt.u32.totalorder %s788_s4, %s891_s0 }
  0x34   : > { %p562_p3 = pnand %p561_p0, %p560_p13  ;;  %p566_p9 = scmp.lt.u32.totalorder %s564_s9, %s559_s6 }
  0x35   : > { %p568_p1 = scmp.lt.u32.totalorder %s559_s6, %s788_s4 }
  0x36   : > { %p563_p5 = pneg %p562_p3  ;;  %p567_p2 = por %p566_p9, %p565_p7 }
  0x38   : > { %p569_p4 = por %p568_p1, %p567_p2 }
  0x3a   : > { %p570_p6 = pnand %p569_p4, %p563_p5 }
  0x3c   : > { %573 = shalt.err (!%p570_p6)
}
  0x3d   : > { %s574_s27 = scalar_lea.vmem %s794_s25, 128  ;;  %s664_s28 = smov [#allocation2]  }
  0x3e   : > { %p575_p8 = scmp.ne.s32.totalorder %s794_s25, %s574_s27  ;;  %s579_s29 = sshll.u32 %s664_s28, 4  ;;  %s580_s29 = int_to_ptr.vmem [resolvable:$false] %s579_s29 }
  0x3f   : > { %s581_s23 = scalar_lea.vmem %s580_s29, 256  ;;  %p582_p3 = scmp.lt.s32.totalorder %s794_s25, %s580_s29 }
  0x40   : > { %p577_p10 = pnand %p575_p8, %p561_p0  ;;  %p583_p7 = scmp.lt.s32.totalorder %s581_s23, %s574_s27 }
  0x42   : > { %p578_p13 = pneg %p577_p10  ;;  %p584_p9 = por %p583_p7, %p582_p3 }
  0x44   : > { %p585_p2 = pnand %p584_p9, %p578_p13 }
  0x46   : > { %588 = shalt.err (!%p585_p2)
}
  0x47   : > { %477 = dma.hbm_to_vmem [thread:$0]  (!%p790_p11), %s788_s4, 128, %s794_s25, %s149_s5  }
  0x48   : > { %p905_p5 = scmp.ne.s32.totalorder %s900_s20, 0 }
  0x49   : > { %s824_s30 = sand.u32 (!%p905_p5), 1, %s651_s13   ;;  %p906_p0 = scmp.ne.s32.totalorder (!%p905_p5), %s898_s18, 0 }
  0x4a   : > { %168 = sbr.rel (%p905_p5) target bundleno = 346 (0x15a), region = 32  ;;  %s417_s22 = sshll.u32 (!%p905_p5), %s824_s30, 3 }
  0x4b   : > { %s171_s6 = scalar_lea.sflag (!%p905_p5), [#allocation3], %s824_s30  ;;  %s174_s7 = scalar_lea.vmem (!%p905_p5), [#allocation2], %s417_s22 }
  0x51   : > { %634 = dma.done.wait (%p906_p0), %s171_s6, 128  }
  0x52   : > { %636 = vsyncadd (%p906_p0), %s171_s6, 4294967168  ;;  %p907_p11 = scmp.eq.s32.totalorder %s709_s16, 0 }
  0x54   : > { %638 = dma.done.wait (%p907_p11), [#allocation6], 1024   ;;  %p908_p1 = pmov %p907_p11 }
  0x55   : > { %v665_v0 = vmov 0.0   ;;  %vm666_vm0 = vmmov 0   ;;  %v523_v1 = vld [vmem:[#allocation5] sm:$0xff]   ;;  %v524_v2 = vld [vmem:[#allocation5 + $0x8] sm:$0xff]   ;;  %v525_v3 = vld [vmem:[#allocation5 + $0x10] sm:$0xff]   ;;  %s430_s4 = sshll.u32 %s709_s16, 7 }
  0x56   : > { %640 = vsyncadd (%p908_p1), [#allocation6], 4294966272  ;;  %442 = vmatprep.subr.bf16.mxu0 %v665_v0  ;;  %458 = vmatprep.mubr.msk.bf16.mxu0 %vm666_vm0, %v665_v0  ;;  %v526_v4 = vld [vmem:[#allocation5 + $0x18] sm:$0xff]   ;;  %v527_v5 = vld [vmem:[#allocation5 + $0x20] sm:$0xff]   ;;  %s200_s25 = scalar_lea.vmem [#allocation7], %s417_s22  ;;  %s847_s9 = scalar_lea.hbm %s894_s3, %s430_s4 }
  0x57   : > { %443 = vmatpush3.bf16.msra.mxu0 %v523_v1  ;;  %v528_v6 = vld [vmem:[#allocation5 + $0x28] sm:$0xff]   ;;  %v529_v7 = vld [vmem:[#allocation5 + $0x30] sm:$0xff]   ;;  %v530_v8 = vld [vmem:[#allocation5 + $0x38] sm:$0xff]   ;;  %s330_s26 = sshll.u32 %s200_s25, 4  ;;  %s317_s16 = scalar_lea.sflag [#allocation4], %s824_s30  ;;  %s849_s26 = int_to_ptr.vmem [resolvable:$true] %s330_s26 }
  0x58   : > { %444 = vmatprep.subr.bf16.mxu0 %v665_v0  ;;  %v202_v9 = vld [vmem:[%s174_s7] sm:$0xff]  ;;  %s589_s10 = scalar_lea.vmem %s849_s26, 128  ;;  %s667_s11 = smov [#allocation7]  }
  0x59   : > { %v203_v10 = vpack.c.bf16 %v202_v9, %v202_v9  ;;  %v420_v11 = vld [vmem:[%s893_s2] ss:$0 sm:$0xff]  ;;  %p590_p4 = scmp.ne.s32.totalorder %s849_s26, %s589_s10  ;;  %s593_s27 = sshll.u32 %s667_s11, 4  ;;  %s594_s27 = int_to_ptr.vmem [resolvable:$false] %s593_s27 }
  0x5a   : > { %s595_s28 = scalar_lea.vmem %s594_s27, 256  ;;  %p596_p10 = scmp.lt.s32.totalorder %s849_s26, %s594_s27 }
  0x5b   : > { %445 = vmatpush3.bf16.msra.mxu0 %v524_v2  ;;  %p591_p6 = pnand %p590_p4, %p779_p12  ;;  %p597_p13 = scmp.lt.s32.totalorder %s595_s28, %s589_s10 }
  0x5c   : > { %446 = vmatprep.subr.bf16.mxu0 %v665_v0 }
  0x5d   : > { %p592_p8 = pneg %p591_p6  ;;  %p598_p3 = por %p597_p13, %p596_p10 }
  0x5f   : > { %447 = vmatpush3.bf16.msra.mxu0 %v525_v3  ;;  %p599_p7 = pnand %p598_p3, %p592_p8 }
  0x60   : > { %448 = vmatprep.subr.bf16.mxu0 %v665_v0 }
  0x63   : > { %449 = vmatpush3.bf16.msra.mxu0 %v526_v4 }
  0x64   : > { %450 = vmatprep.subr.bf16.mxu0 %v665_v0 }
  0x67   : > { %451 = vmatpush3.bf16.msra.mxu0 %v527_v5 }
  0x68   : > { %452 = vmatprep.subr.bf16.mxu0 %v665_v0 }
  0x6b   : > { %453 = vmatpush3.bf16.msra.mxu0 %v528_v6 }
  0x6c   : > { %454 = vmatprep.subr.bf16.mxu0 %v665_v0 }
  0x6f   : > { %455 = vmatpush3.bf16.msra.mxu0 %v529_v7 }
  0x70   : > { %456 = vmatprep.subr.bf16.mxu0 %v665_v0 }
  0x73   : > { %457 = vmatpush3.bf16.msra.mxu0 %v530_v8 }
  0x76   : > { %459 = vmatmul.mubr.bf16.vlgmr.msra.gmra.mrb[0].mxu0 %v203_v10 }
 0x149   : > { %v309_v12 = vpop.f32.mrb[0].mxu0 }
 0x14a   : > { %v310_v13 = vadd.f32 %v420_v11, %v309_v12  ;;  %v460_v14 = vpop.f32.mrb[1].mxu0 }
 0x14b   : > { %v312_v15 = vpop.f32.mrb[2].mxu0 }
 0x14c   : > { %315 = vst [vmem:[%s200_s25] sm:$0xff] %v310_v13  ;;  %v461_v16 = vpop.f32.mrb[3].mxu0 }
 0x14d   : > { %602 = shalt.err (!%p599_p7)
}
 0x14e   : > { %s603_s29 = scalar_lea.hbm %s847_s9, 128  ;;  %s607_s22 = scalar_lea.hbm %s894_s3, 256 }
 0x14f   : > { %p604_p9 = scmp.ne.s32.totalorder %s847_s9, %s603_s29  ;;  %p608_p0 = scmp.lt.u32.totalorder %s847_s9, %s894_s3 }
 0x150   : > { %p609_p11 = scmp.lt.u32.totalorder %s607_s22, %s603_s29  ;;  %p611_p4 = scmp.lt.u32.totalorder %s603_s29, %s847_s9 }
 0x151   : > { %p605_p2 = pnand %p604_p9, %p779_p12 }
 0x152   : > { %p610_p1 = por %p609_p11, %p608_p0 }
 0x153   : > { %p606_p5 = pneg %p605_p2 }
 0x154   : > { %p612_p6 = por %p611_p4, %p610_p1 }
 0x156   : > { %p613_p8 = pnand %p612_p6, %p606_p5 }
 0x158   : > { %616 = shalt.err (!%p613_p8)
}
 0x159   : > { %468 = dma.vmem_to_hbm [thread:$0]  (%p779_p12), %s849_s26, 128, %s847_s9, %s317_s16  }
 0x15a PF: > { %s342_s18 = sand.u32 1, %s647_s12   ;;  %p909_p10 = scmp.ne.s32.totalorder %s899_s19, 0 }
 0x15b   : > { %p910_p13 = scmp.ge.s32.totalorder %s659_s15, 2  ;;  %s343_s20 = scalar_lea.sflag [#allocation4], %s342_s18 }
 0x15d   : > { %p479_p3 = pnand %p910_p13, %p909_p10 }
 0x15f   : > { %642 = dma.done.wait (!%p479_p3), %s343_s20, 128  }
 0x160   : > { %644 = vsyncadd (!%p479_p3), %s343_s20, 4294967168  ;;  %p17_p7 = scmp.ge.s32.totalorder %s744_s24, 4   ;;  %s911_s12 = smov %s651_s13 }
 0x161   : > { %s912_s13 = smov %s655_s14  ;;  %s913_s14 = smov %s775_s17 }
 0x162   : > { %s914_s15 = smov %s744_s24  ;;  %19 = sbr.rel (!%p17_p7) target bundleno = 6 (0x6), region = 81 }
 0x169   :  { %348 = vsyncpa [#allocation3], 1 }
 0x16a   :  { %350 = vsyncpa [#allocation3 + $0x1], 1 }
 0x16b   :  { %351 = vsyncpa [#allocation6], 1 }
 0x16c   :  { %352 = vsyncpa [#allocation4], 1 }
 0x16d   :  { %354 = vsyncpa [#allocation4 + $0x1], 1 }

</bundles_post_ra>
